<compile_context>
chip_gen: v7x
topology: tpu7x:2x2x1
jax: 0.10.0
libtpu: 0.0.40
codegen_flags: <defaults>
</compile_context>

<pallas_src>
import functools

import jax
import jax.numpy as jnp
from jax.experimental import pallas as pl
from jax.experimental.pallas import tpu as pltpu

LN_EPS = 1e-5  # PyTorch nn.LayerNorm default
_MIB = 1 << 20


def _round_up(n, m):
    return (n + m - 1) // m * m


def _vmem_capacity_bytes():
    """Best-effort physical VMEM capacity (bytes) of the attached TPU."""
    try:
        info = pltpu.get_tpu_info()
        cap = getattr(info, "vmem_capacity_bytes", None)
        if cap:
            return int(cap)
    except Exception:
        pass
    try:
        kind = jax.devices()[0].device_kind.lower()
    except Exception:
        kind = ""
    if "v7" in kind or "7x" in kind:
        return 64 * _MIB       # v7x: 64 MiB per TensorCore
    return 128 * _MIB          # v5e / v6e: 128 MiB


def _select_tiles(rows, dim, dim_ff, vmem_cap, tile_rows, tile_ff):
    """Pick (tile_rows, rows_padded, tile_ff, dim_ff_padded, vmem_limit)."""
    if vmem_cap >= 128 * _MIB:
        vmem_limit = 100 * _MIB        # v5e / v6e: plenty of headroom
    elif vmem_cap >= 64 * _MIB:
        vmem_limit = 52 * _MIB         # v7x: 64 MiB physical, leave headroom
    else:
        vmem_limit = max(16 * _MIB, vmem_cap // 2)
    budget = vmem_limit - 2 * _MIB     # slack for biases / LN params / misc

    def footprint(tr_, tf_):
        # x in (2x bf16) + out (2x bf16) + xn scratch (bf16) + acc scratch (f32)
        act = (4 + 4 + 2 + 4) * tr_ * dim
        # W1 + W2 ff-tiles, bf16, double-buffered
        wts = 2 * 2 * 2 * tf_ * dim
        return act + wts

    if tile_rows is None and tile_ff is None:
        tr = 512
        tf = 1024 if vmem_cap >= 128 * _MIB else 512
        # Shrink the hidden tile first (only adds ff trips), then the row tile.
        while footprint(tr, tf) > budget and tf > 128:
            tf //= 2
        while footprint(tr, tf) > budget and tr > 128:
            tr //= 2
    else:
        tr = tile_rows if tile_rows is not None else 512
        tf = tile_ff if tile_ff is not None else 512

    assert tr % 32 == 0, "tile_rows must be a multiple of 32"

    # Row tiling: never wider than the (32-padded) row count.
    tr = min(tr, _round_up(rows, 32))
    rows_p = _round_up(rows, tr)
    # Prefer >= 2 row tiles so the "parallel" axis can be sharded across
    # v7x's two TensorCores (megacore); keep tiles MXU-friendly (>= 128).
    while rows_p // tr < 2 and tr >= 256 and tr % 64 == 0:
        tr //= 2
        rows_p = _round_up(rows, tr)

    # Hidden tiling: single full tile if it fits, else 128-aligned tiles.
    if dim_ff <= tf:
        tf = dim_ff
        dim_ff_p = dim_ff
    else:
        assert tf % 128 == 0, "tile_ff must be a multiple of 128"
        dim_ff_p = _round_up(dim_ff, tf)

    return tr, rows_p, tf, dim_ff_p, vmem_limit


def _ffn_kernel(x_ref, gamma_ref, beta_ref, w1_ref, b1_ref, w2_ref, b2_ref,
                o_ref, xn_ref, acc_ref):
    ff = pl.program_id(1)

    @pl.when(ff == 0)
    def _():
        # LayerNorm in f32, computed once per row tile, cached as bf16 for MXU.
        x = x_ref[...].astype(jnp.float32)
        mean = jnp.mean(x, axis=-1, keepdims=True)
        centered = x - mean
        var = jnp.mean(centered * centered, axis=-1, keepdims=True)
        xn = centered * jax.lax.rsqrt(var + LN_EPS)
        xn = (xn * gamma_ref[...].astype(jnp.float32)
              + beta_ref[...].astype(jnp.float32))
        xn_ref[...] = xn.astype(xn_ref.dtype)
        acc_ref[...] = jnp.zeros_like(acc_ref)

    # Linear(dim -> tile_ff) + SiLU (f32 math on the MXU f32 accumulation).
    h = jnp.dot(xn_ref[...], w1_ref[...], preferred_element_type=jnp.float32)
    h = h + b1_ref[...].astype(jnp.float32)
    h = h * jax.nn.sigmoid(h)  # SiLU
    # Dropout(p=0.0) -> identity.
    # TODO(synk): add stochastic dropout via pltpu.prng_random_bits if a
    # nonzero rate is ever needed.

    # Accumulate Linear(tile_ff -> dim) into the f32 accumulator.
    acc_ref[...] += jnp.dot(h.astype(w2_ref.dtype), w2_ref[...],
                            preferred_element_type=jnp.float32)

    @pl.when(ff == pl.num_programs(1) - 1)
    def _():
        y = acc_ref[...] + b2_ref[...].astype(jnp.float32)
        o_ref[...] = y.astype(o_ref.dtype)


@functools.partial(jax.jit, static_argnames=("tile_rows", "tile_ff"))
def feed_forward(x, gamma, beta, w1, b1, w2, b2, *, tile_rows=None, tile_ff=None):
    """x: (B, S, dim) -> (B, S, dim)."""
    orig_dtype = x.dtype
    B, S, dim = x.shape
    dim_ff = w1.shape[1]
    rows = B * S

    vmem_cap = _vmem_capacity_bytes()
    tr, rows_p, tf, dim_ff_p, vmem_limit = _select_tiles(
        rows, dim, dim_ff, vmem_cap, tile_rows, tile_ff)

    # Activations in bf16 (halves HBM traffic + the x/out VMEM blocks).
    x2d = x.reshape(rows, dim).astype(jnp.bfloat16)
    if rows_p != rows:
        x2d = jnp.pad(x2d, ((0, rows_p - rows), (0, 0)))

    # Weights in bf16; biases / LN params in f32.
    w1b = w1.astype(jnp.bfloat16)
    w2b = w2.astype(jnp.bfloat16)
    b1f = b1.astype(jnp.float32)
    b2f = b2.astype(jnp.float32)
    if dim_ff_p != dim_ff:
        pad = dim_ff_p - dim_ff
        w1b = jnp.pad(w1b, ((0, 0), (0, pad)))
        b1f = jnp.pad(b1f, ((0, pad),))
        w2b = jnp.pad(w2b, ((0, pad), (0, 0)))

    gamma2d = gamma.astype(jnp.float32).reshape(1, dim)
    beta2d = beta.astype(jnp.float32).reshape(1, dim)
    b1_2d = b1f.reshape(1, dim_ff_p)
    b2_2d = b2f.reshape(1, dim)

    grid = (rows_p // tr, dim_ff_p // tf)
    n_row_tiles = rows_p // tr

    cost = pl.CostEstimate(
        flops=int(2 * rows_p * dim * dim_ff_p * 2),
        transcendentals=int(rows_p * dim_ff_p + rows_p),
        bytes_accessed=int(
            rows_p * dim * 2                           # x in (bf16)
            + rows_p * dim * 2                         # out (bf16)
            + n_row_tiles * 2 * dim * dim_ff_p * 2),   # weights re-streamed per row tile
    )

    out = pl.pallas_call(
        _ffn_kernel,
        out_shape=jax.ShapeDtypeStruct((rows_p, dim), jnp.bfloat16),
        grid_spec=pltpu.PrefetchScalarGridSpec(
            num_scalar_prefetch=0,
            grid=grid,
            in_specs=[
                pl.BlockSpec((tr, dim), lambda i, j: (i, 0)),   # x rows
                pl.BlockSpec((1, dim), lambda i, j: (0, 0)),    # gamma
                pl.BlockSpec((1, dim), lambda i, j: (0, 0)),    # beta
                pl.BlockSpec((dim, tf), lambda i, j: (0, j)),   # W1 ff-tile
                pl.BlockSpec((1, tf), lambda i, j: (0, j)),     # b1 ff-tile
                pl.BlockSpec((tf, dim), lambda i, j: (j, 0)),   # W2 ff-tile
                pl.BlockSpec((1, dim), lambda i, j: (0, 0)),    # b2
            ],
            out_specs=pl.BlockSpec((tr, dim), lambda i, j: (i, 0)),
            scratch_shapes=[
                pltpu.VMEM((tr, dim), jnp.bfloat16),   # cached LayerNorm output
                pltpu.VMEM((tr, dim), jnp.float32),    # f32 accumulator
            ],
        ),
        compiler_params=pltpu.CompilerParams(
            dimension_semantics=("parallel", "arbitrary"),
            vmem_limit_bytes=int(vmem_limit)),
        cost_estimate=cost,
    )(x2d, gamma2d, beta2d, w1b, b1_2d, w2b, b2_2d)

    return out[:rows].reshape(B, S, dim).astype(orig_dtype)


def feed_forward_ref(x, gamma, beta, w1, b1, w2, b2):
    """Pure-JAX f32 reference for correctness check."""
    xf = x.astype(jnp.float32)
    mean = jnp.mean(xf, axis=-1, keepdims=True)
    var = jnp.mean((xf - mean) ** 2, axis=-1, keepdims=True)
    xn = (xf - mean) * jax.lax.rsqrt(var + LN_EPS) * gamma + beta
    h = xn @ w1 + b1
    h = h * jax.nn.sigmoid(h)
    return (h @ w2 + b2).astype(x.dtype)


def _make_params(key, dim, dim_ff):
    kw1, kb1, kw2, kb2 = jax.random.split(key, 4)
    gamma = jnp.ones((dim,), jnp.float32)
    beta = jnp.zeros((dim,), jnp.float32)
    w1 = jax.random.normal(kw1, (dim, dim_ff), jnp.float32) * (1.0 / dim ** 0.5)
    b1 = jax.random.normal(kb1, (dim_ff,), jnp.float32) * 0.01
    w2 = jax.random.normal(kw2, (dim_ff, dim), jnp.float32) * (1.0 / dim_ff ** 0.5)
    b2 = jax.random.normal(kb2, (dim,), jnp.float32) * 0.01
    return gamma, beta, w1, b1, w2, b2


if __name__ == "__main__":
    key = jax.random.PRNGKey(0)
    k1, k2, k3, k4, k5, k6 = jax.random.split(key, 6)

    # Case 1: small shapes matching the module (single ff tile, no padding).
    B, S, dim, dim_ff = 2, 8, 32, 64
    x = jax.random.normal(k1, (B, S, dim), dtype=jnp.float32)
    params = _make_params(k2, dim, dim_ff)
    y = jax.block_until_ready(feed_forward(x, *params))
    y_ref = feed_forward_ref(x, *params)
    assert y.shape == (B, S, dim)
    assert jnp.allclose(y, y_ref, atol=5e-2, rtol=5e-2), "case1 mismatch"

    # Case 2: row padding (18 -> 32 rows) and dim_ff tiling/padding
    # (192 -> 256 hidden, two 128-wide ff tiles) with the f32 accumulator path.
    B2, S2, dim2, dim_ff2 = 2, 9, 128, 192
    x2 = jax.random.normal(k3, (B2, S2, dim2), dtype=jnp.float32)
    params2 = _make_params(k4, dim2, dim_ff2)
    y2 = jax.block_until_ready(feed_forward(x2, *params2, tile_ff=128))
    y2_ref = feed_forward_ref(x2, *params2)
    assert y2.shape == (B2, S2, dim2)
    assert jnp.allclose(y2, y2_ref, atol=5e-2, rtol=5e-2), "case2 mismatch"

    # Case 3: auto tile selection; enough rows that the parallel row axis is
    # split into >= 2 tiles (megacore path on v7x).
    B3, S3, dim3, dim_ff3 = 4, 80, 128, 256
    x3 = jax.random.normal(k5, (B3, S3, dim3), dtype=jnp.float32)
    params3 = _make_params(k6, dim3, dim_ff3)
    y3 = jax.block_until_ready(feed_forward(x3, *params3))
    y3_ref = feed_forward_ref(x3, *params3)
    assert y3.shape == (B3, S3, dim3)
    assert jnp.allclose(y3, y3_ref, atol=5e-2, rtol=5e-2), "case3 mismatch"

    print("KERNEL_OK")
</pallas_src>

<mosaic_0001>
module attributes {stable_mosaic.version = 11 : i64} {
  func.func @_ffn_kernel(%arg0: i32, %arg1: i32, %arg2: memref<32x32xbf16, #tpu.memory_space<vmem>>, %arg3: memref<1x32xf32, #tpu.memory_space<vmem>>, %arg4: memref<1x32xf32, #tpu.memory_space<vmem>>, %arg5: memref<32x64xbf16, #tpu.memory_space<vmem>>, %arg6: memref<1x64xf32, #tpu.memory_space<vmem>>, %arg7: memref<64x32xbf16, #tpu.memory_space<vmem>>, %arg8: memref<1x32xf32, #tpu.memory_space<vmem>>, %arg9: memref<32x32xbf16, #tpu.memory_space<vmem>>, %arg10: memref<32x32xbf16, #tpu.memory_space<vmem>>, %arg11: memref<32x32xf32, #tpu.memory_space<vmem>>) attributes {dimension_semantics = [#tpu.dimension_semantics<parallel>, #tpu.dimension_semantics<arbitrary>], iteration_bounds = array<i64: 1, 1>, scalar_prefetch = 0 : i64, scratch_operands = 2 : i64, tpu.core_type = #tpu.core_type<tc>, window_params = [{transform_indices = @transform_0, window_bounds = array<i64: 32, 32>}, {pipeline_mode = #tpu.pipeline_mode<synchronous>, transform_indices = @transform_1, window_bounds = array<i64: 1, 32>}, {pipeline_mode = #tpu.pipeline_mode<synchronous>, transform_indices = @transform_2, window_bounds = array<i64: 1, 32>}, {transform_indices = @transform_3, window_bounds = array<i64: 32, 64>}, {transform_indices = @transform_4, window_bounds = array<i64: 1, 64>}, {transform_indices = @transform_5, window_bounds = array<i64: 64, 32>}, {pipeline_mode = #tpu.pipeline_mode<synchronous>, transform_indices = @transform_6, window_bounds = array<i64: 1, 32>}, {transform_indices = @transform_7, window_bounds = array<i64: 32, 32>}]} {
    %c0_i32 = arith.constant 0 : i32
    %0 = arith.cmpi eq, %arg1, %c0_i32 : i32
    %1 = arith.extui %0 : i1 to i32
    %c0_i32_0 = arith.constant 0 : i32
    %2 = arith.cmpi ne, %1, %c0_i32_0 : i32
    scf.if %2 {
      %c0_16 = arith.constant 0 : index
      %c0_17 = arith.constant 0 : index
      %24 = vector.load %arg2[%c0_16, %c0_17] : memref<32x32xbf16, #tpu.memory_space<vmem>>, vector<32x32xbf16>
      %25 = arith.extf %24 : vector<32x32xbf16> to vector<32x32xf32>
      %cst_18 = arith.constant dense<0.000000e+00> : vector<32xf32>
      %26 = vector.multi_reduction <add>, %25, %cst_18 [1] : vector<32x32xf32> to vector<32xf32>
      %27 = vector.shape_cast %26 : vector<32xf32> to vector<32x1xf32>
      %cst_19 = arith.constant 3.200000e+01 : f32
      %28 = vector.broadcast %cst_19 : f32 to vector<32x1xf32>
      %29 = arith.divf %27, %28 : vector<32x1xf32>
      %30 = vector.broadcast %29 : vector<32x1xf32> to vector<32x32xf32>
      %31 = arith.subf %25, %30 : vector<32x32xf32>
      %32 = arith.mulf %31, %31 : vector<32x32xf32>
      %cst_20 = arith.constant dense<0.000000e+00> : vector<32xf32>
      %33 = vector.multi_reduction <add>, %32, %cst_20 [1] : vector<32x32xf32> to vector<32xf32>
      %34 = vector.shape_cast %33 : vector<32xf32> to vector<32x1xf32>
      %cst_21 = arith.constant 3.200000e+01 : f32
      %35 = vector.broadcast %cst_21 : f32 to vector<32x1xf32>
      %36 = arith.divf %34, %35 : vector<32x1xf32>
      %cst_22 = arith.constant 9.99999974E-6 : f32
      %37 = vector.broadcast %cst_22 : f32 to vector<32x1xf32>
      %38 = arith.addf %36, %37 : vector<32x1xf32>
      %39 = math.rsqrt %38 : vector<32x1xf32>
      %40 = vector.broadcast %39 : vector<32x1xf32> to vector<32x32xf32>
      %41 = arith.mulf %31, %40 : vector<32x32xf32>
      %c0_23 = arith.constant 0 : index
      %c0_24 = arith.constant 0 : index
      %42 = vector.load %arg3[%c0_23, %c0_24] : memref<1x32xf32, #tpu.memory_space<vmem>>, vector<1x32xf32>
      %43 = vector.broadcast %42 : vector<1x32xf32> to vector<32x32xf32>
      %44 = arith.mulf %41, %43 : vector<32x32xf32>
      %c0_25 = arith.constant 0 : index
      %c0_26 = arith.constant 0 : index
      %45 = vector.load %arg4[%c0_25, %c0_26] : memref<1x32xf32, #tpu.memory_space<vmem>>, vector<1x32xf32>
      %46 = vector.broadcast %45 : vector<1x32xf32> to vector<32x32xf32>
      %47 = arith.addf %44, %46 : vector<32x32xf32>
      %48 = arith.truncf %47 : vector<32x32xf32> to vector<32x32xbf16>
      %c0_27 = arith.constant 0 : index
      %c0_28 = arith.constant 0 : index
      %49 = vector.load %arg10[%c0_27, %c0_28] : memref<32x32xbf16, #tpu.memory_space<vmem>>, vector<32x32xbf16>
      tpu.vector_store %arg10[%c0_27, %c0_28], %48 {strides = array<i32>} : memref<32x32xbf16, #tpu.memory_space<vmem>>, vector<32x32xbf16>,
      %cst_29 = arith.constant 0.000000e+00 : f32
      %50 = vector.broadcast %cst_29 : f32 to vector<32x32xf32>
      %c0_30 = arith.constant 0 : index
      %c0_31 = arith.constant 0 : index
      %51 = vector.load %arg11[%c0_30, %c0_31] : memref<32x32xf32, #tpu.memory_space<vmem>>, vector<32x32xf32>
      tpu.vector_store %arg11[%c0_30, %c0_31], %50 {strides = array<i32>} : memref<32x32xf32, #tpu.memory_space<vmem>>, vector<32x32xf32>,
    } else {
    }
    %c0 = arith.constant 0 : index
    %c0_1 = arith.constant 0 : index
    %3 = vector.load %arg10[%c0, %c0_1] : memref<32x32xbf16, #tpu.memory_space<vmem>>, vector<32x32xbf16>
    %c0_2 = arith.constant 0 : index
    %c0_3 = arith.constant 0 : index
    %4 = vector.load %arg5[%c0_2, %c0_3] : memref<32x64xbf16, #tpu.memory_space<vmem>>, vector<32x64xbf16>
    %cst = arith.constant dense<0.000000e+00> : vector<32x64xf32>
    %5 = tpu.matmul %3, %4, %cst {dimension_numbers = #tpu.dot_dimension_numbers<[1], [0], [0], [1], [0, 0, 1, 1], [], []>} : vector<32x32xbf16>, vector<32x64xbf16>, vector<32x64xf32> -> vector<32x64xf32>
    %c0_4 = arith.constant 0 : index
    %c0_5 = arith.constant 0 : index
    %6 = vector.load %arg6[%c0_4, %c0_5] : memref<1x64xf32, #tpu.memory_space<vmem>>, vector<1x64xf32>
    %7 = vector.broadcast %6 : vector<1x64xf32> to vector<32x64xf32>
    %8 = arith.addf %5, %7 : vector<32x64xf32>
    %9 = arith.negf %8 : vector<32x64xf32>
    %10 = math.exp %9 : vector<32x64xf32>
    %cst_6 = arith.constant 1.000000e+00 : f32
    %11 = vector.broadcast %cst_6 : f32 to vector<32x64xf32>
    %12 = arith.addf %11, %10 : vector<32x64xf32>
    %13 = arith.divf %11, %12 : vector<32x64xf32>
    %14 = arith.mulf %8, %13 : vector<32x64xf32>
    %c0_7 = arith.constant 0 : index
    %c0_8 = arith.constant 0 : index
    %15 = vector.load %arg11[%c0_7, %c0_8] : memref<32x32xf32, #tpu.memory_space<vmem>>, vector<32x32xf32>
    %16 = arith.truncf %14 : vector<32x64xf32> to vector<32x64xbf16>
    %c0_9 = arith.constant 0 : index
    %c0_10 = arith.constant 0 : index
    %17 = vector.load %arg7[%c0_9, %c0_10] : memref<64x32xbf16, #tpu.memory_space<vmem>>, vector<64x32xbf16>
    %cst_11 = arith.constant dense<0.000000e+00> : vector<32x32xf32>
    %18 = tpu.matmul %16, %17, %cst_11 {dimension_numbers = #tpu.dot_dimension_numbers<[1], [0], [0], [1], [0, 0, 1, 1], [], []>} : vector<32x64xbf16>, vector<64x32xbf16>, vector<32x32xf32> -> vector<32x32xf32>
    %19 = arith.addf %15, %18 : vector<32x32xf32>
    %c0_12 = arith.constant 0 : index
    %c0_13 = arith.constant 0 : index
    %20 = vector.load %arg11[%c0_12, %c0_13] : memref<32x32xf32, #tpu.memory_space<vmem>>, vector<32x32xf32>
    tpu.vector_store %arg11[%c0_12, %c0_13], %19 {strides = array<i32>} : memref<32x32xf32, #tpu.memory_space<vmem>>, vector<32x32xf32>,
    %c0_i32_14 = arith.constant 0 : i32
    %21 = arith.cmpi eq, %arg1, %c0_i32_14 : i32
    %22 = arith.extui %21 : i1 to i32
    %c0_i32_15 = arith.constant 0 : i32
    %23 = arith.cmpi ne, %22, %c0_i32_15 : i32
    scf.if %23 {
      %c0_16 = arith.constant 0 : index
      %c0_17 = arith.constant 0 : index
      %24 = vector.load %arg11[%c0_16, %c0_17] : memref<32x32xf32, #tpu.memory_space<vmem>>, vector<32x32xf32>
      %c0_18 = arith.constant 0 : index
      %c0_19 = arith.constant 0 : index
      %25 = vector.load %arg8[%c0_18, %c0_19] : memref<1x32xf32, #tpu.memory_space<vmem>>, vector<1x32xf32>
      %26 = vector.broadcast %25 : vector<1x32xf32> to vector<32x32xf32>
      %27 = arith.addf %24, %26 : vector<32x32xf32>
      %28 = arith.truncf %27 : vector<32x32xf32> to vector<32x32xbf16>
      %c0_20 = arith.constant 0 : index
      %c0_21 = arith.constant 0 : index
      %29 = vector.load %arg9[%c0_20, %c0_21] : memref<32x32xbf16, #tpu.memory_space<vmem>>, vector<32x32xbf16>
      tpu.vector_store %arg9[%c0_20, %c0_21], %28 {strides = array<i32>} : memref<32x32xbf16, #tpu.memory_space<vmem>>, vector<32x32xbf16>,
    } else {
    }
    return
  }
  func.func @transform_0(%arg0: i32, %arg1: i32) -> (i32, i32) {
    %c0_i32 = arith.constant 0 : i32
    %c0_i32_0 = arith.constant 0 : i32
    return %arg0, %c0_i32 : i32, i32
  }
  func.func @transform_1(%arg0: i32, %arg1: i32) -> (i32, i32) {
    %c0_i32 = arith.constant 0 : i32
    %c0_i32_0 = arith.constant 0 : i32
    %c0_i32_1 = arith.constant 0 : i32
    return %c0_i32, %c0_i32_0 : i32, i32
  }
  func.func @transform_2(%arg0: i32, %arg1: i32) -> (i32, i32) {
    %c0_i32 = arith.constant 0 : i32
    %c0_i32_0 = arith.constant 0 : i32
    %c0_i32_1 = arith.constant 0 : i32
    return %c0_i32, %c0_i32_0 : i32, i32
  }
  func.func @transform_3(%arg0: i32, %arg1: i32) -> (i32, i32) {
    %c0_i32 = arith.constant 0 : i32
    %c0_i32_0 = arith.constant 0 : i32
    return %c0_i32, %arg1 : i32, i32
  }
  func.func @transform_4(%arg0: i32, %arg1: i32) -> (i32, i32) {
    %c0_i32 = arith.constant 0 : i32
    %c0_i32_0 = arith.constant 0 : i32
    return %c0_i32, %arg1 : i32, i32
  }
  func.func @transform_5(%arg0: i32, %arg1: i32) -> (i32, i32) {
    %c0_i32 = arith.constant 0 : i32
    %c0_i32_0 = arith.constant 0 : i32
    return %arg1, %c0_i32 : i32, i32
  }
  func.func @transform_6(%arg0: i32, %arg1: i32) -> (i32, i32) {
    %c0_i32 = arith.constant 0 : i32
    %c0_i32_0 = arith.constant 0 : i32
    %c0_i32_1 = arith.constant 0 : i32
    return %c0_i32, %c0_i32_0 : i32, i32
  }
  func.func @transform_7(%arg0: i32, %arg1: i32) -> (i32, i32) {
    %c0_i32 = arith.constant 0 : i32
    %c0_i32_0 = arith.constant 0 : i32
    return %arg0, %c0_i32 : i32, i32
  }
}

</mosaic_0001>

<bundles_post_ra>
// kernel: feed_forward.1
= control target key start
LH: loop header
LB: loop body
LE: loop exit
PB: predicated region body
PF: predicated region fallthrough
CT: control target
= control target key end

     0   :  { %12 = vsyncpa [#allocation5], 0  ;;  %s952_s0 = inlined_call_operand.hbm [shape: bf16[32,32], index: 0, kind: input, shape index: {}]   ;;  %s953_s1 = inlined_call_operand.hbm [shape: f32[1,32], index: 1, kind: input, shape index: {}]   ;;  %s954_s2 = inlined_call_operand.hbm [shape: f32[1,32], index: 2, kind: input, shape index: {}]   ;;  %s955_s3 = inlined_call_operand.hbm [shape: bf16[32,64], index: 3, kind: input, shape index: {}]   ;;  %s956_s4 = inlined_call_operand.hbm [shape: f32[1,64], index: 4, kind: input, shape index: {}]   ;;  %s957_s5 = inlined_call_operand.hbm [shape: bf16[64,32], index: 5, kind: input, shape index: {}]   ;;  %s958_s6 = inlined_call_operand.hbm [shape: f32[1,32], index: 6, kind: input, shape index: {}]   ;;  %s959_s7 = inlined_call_operand.hbm [shape: bf16[32,32], index: 7, kind: output, shape index: {}]  }
   0x1   :  { %13 = vsyncpa [#allocation8], 0 }
   0x2   :  { %14 = vsyncpa [#allocation11], 0 }
   0x3   :  { %15 = vsyncpa [#allocation14], 0 }
   0x4   :  { %16 = vsyncpa [#allocation6], 0  ;;  %s773_s24 = smov [#allocation7]   ;;  %s587_s28 = scalar_lea.hbm %s953_s1, 16 }
   0x5   :  { %s35_s25 = sshll.u32 %s773_s24, 4  ;;  %p588_p0 = scmp.ne.s32.totalorder %s953_s1, %s587_s28  ;;  %s36_s25 = int_to_ptr.vmem [resolvable:$true] %s35_s25 }
   0x6   :  { %p591_p1 = scmp.lt.u32.totalorder %s587_s28, %s953_s1 }
   0x8   :  { %p593_p2 = pnand %p591_p1, %p588_p0 }
   0xa   :  { %596 = shalt.err (!%p593_p2)
}
   0xb   :  { %s597_s10 = scalar_lea.vmem %s36_s25, 16  ;;  %s601_s11 = scalar_lea.vmem %s36_s25, 32 }
   0xc   :  { %p598_p3 = scmp.ne.s32.totalorder %s36_s25, %s597_s10  ;;  %p602_p4 = scmp.lt.s32.totalorder %s36_s25, %s36_s25 }
   0xd   :  { %p603_p5 = scmp.lt.s32.totalorder %s601_s11, %s597_s10 }
   0xf   :  { %p604_p6 = por %p603_p5, %p602_p4 }
  0x11   :  { %p605_p7 = pnand %p604_p6, %p598_p3 }
  0x13   :  { %608 = shalt.err (!%p605_p7)
}
  0x14   :  { %38 = dma.hbm_to_vmem [thread:$0]  %s953_s1, 16, %s36_s25, [#allocation8]  }
  0x15   :  { %s774_s14 = smov [#allocation10]   ;;  %s775_s16 = smov [#allocation13]  }
  0x16   :  { %s54_s15 = sshll.u32 %s774_s14, 4  ;;  %s76_s17 = sshll.u32 %s775_s16, 4  ;;  %s55_s15 = int_to_ptr.vmem [resolvable:$true] %s54_s15  ;;  %s77_s17 = int_to_ptr.vmem [resolvable:$true] %s76_s17 }
  0x17   :  { %s609_s20 = scalar_lea.hbm %s955_s3, 256 }
  0x18   :  { %p610_p8 = scmp.ne.s32.totalorder %s955_s3, %s609_s20  ;;  %p613_p9 = scmp.lt.u32.totalorder %s609_s20, %s955_s3 }
  0x1a   :  { %p615_p10 = pnand %p613_p9, %p610_p8 }
  0x1c   :  { %618 = shalt.err (!%p615_p10)
}
  0x1d   :  { %s619_s1 = scalar_lea.vmem %s55_s15, 256  ;;  %p624_p12 = scmp.lt.s32.totalorder %s55_s15, %s55_s15 }
  0x1e   :  { %p620_p11 = scmp.ne.s32.totalorder %s55_s15, %s619_s1  ;;  %p625_p13 = scmp.lt.s32.totalorder %s619_s1, %s619_s1 }
  0x20   :  { %p626_p0 = por %p625_p13, %p624_p12 }
  0x22   :  { %p627_p1 = pnand %p626_p0, %p620_p11 }
  0x24   :  { %630 = shalt.err (!%p627_p1)
}
  0x25   :  { %s776_s25 = smov 64   ;;  %s777_s26 = smov 4  }
  0x26   :  { %60 = dma.hbm_to_vmem [thread:$0]  %s955_s3, 256, %s55_s15, [#allocation11], %s776_s25, %s776_s25, %s777_s26  }
  0x27   :  { %s631_s8 = scalar_lea.hbm %s957_s5, 512 }
  0x28   :  { %p632_p2 = scmp.ne.s32.totalorder %s957_s5, %s631_s8  ;;  %p635_p3 = scmp.lt.u32.totalorder %s631_s8, %s957_s5 }
  0x2a   :  { %p637_p4 = pnand %p635_p3, %p632_p2 }
  0x2c   :  { %640 = shalt.err (!%p637_p4)
}
  0x2d   :  { %s641_s13 = scalar_lea.vmem %s77_s17, 512  ;;  %p646_p6 = scmp.lt.s32.totalorder %s77_s17, %s77_s17 }
  0x2e   :  { %p642_p5 = scmp.ne.s32.totalorder %s77_s17, %s641_s13  ;;  %p647_p7 = scmp.lt.s32.totalorder %s641_s13, %s641_s13 }
  0x30   :  { %p648_p8 = por %p647_p7, %p646_p6 }
  0x32   :  { %p649_p9 = pnand %p648_p8, %p642_p5 }
  0x34   :  { %652 = shalt.err (!%p649_p9)
}
  0x35   :  { %82 = dma.hbm_to_vmem [thread:$0]  %s957_s5, 512, %s77_s17, [#allocation14], %s776_s25, %s776_s25, %s777_s26  }
  0x36   :  { %s778_s15 = smov [#allocation4]   ;;  %s779_s18 = smov [#allocation9]  }
  0x37   :  { %s22_s16 = sshll.u32 %s778_s15, 4  ;;  %s45_s19 = sshll.u32 %s779_s18, 4  ;;  %s23_s16 = int_to_ptr.vmem [resolvable:$true] %s22_s16  ;;  %s46_s19 = int_to_ptr.vmem [resolvable:$true] %s45_s19 }
  0x38   :  { %s653_s22 = scalar_lea.hbm %s952_s0, 256 }
  0x39   :  { %p654_p10 = scmp.ne.s32.totalorder %s952_s0, %s653_s22  ;;  %p657_p11 = scmp.lt.u32.totalorder %s653_s22, %s952_s0 }
  0x3b   :  { %p659_p12 = pnand %p657_p11, %p654_p10 }
  0x3d   :  { %662 = shalt.err (!%p659_p12)
}
  0x3e   :  { %s663_s5 = scalar_lea.vmem %s23_s16, 256  ;;  %p668_p0 = scmp.lt.s32.totalorder %s23_s16, %s23_s16 }
  0x3f   :  { %p664_p13 = scmp.ne.s32.totalorder %s23_s16, %s663_s5  ;;  %p669_p1 = scmp.lt.s32.totalorder %s663_s5, %s663_s5 }
  0x41   :  { %p670_p2 = por %p669_p1, %p668_p0 }
  0x43   :  { %p671_p3 = pnand %p670_p2, %p664_p13 }
  0x45   :  { %674 = shalt.err (!%p671_p3)
}
  0x46   :  { %28 = dma.hbm_to_vmem [thread:$0]  %s952_s0, 256, %s23_s16, [#allocation5], %s776_s25, %s776_s25, %s777_s26  }
  0x47   :  { %s675_s8 = scalar_lea.hbm %s954_s2, 16 }
  0x48   :  { %p676_p4 = scmp.ne.s32.totalorder %s954_s2, %s675_s8  ;;  %p679_p5 = scmp.lt.u32.totalorder %s675_s8, %s954_s2 }
  0x4a   :  { %p681_p6 = pnand %p679_p5, %p676_p4 }
  0x4c   :  { %684 = shalt.err (!%p681_p6)
}
  0x4d   :  { %s685_s13 = scalar_lea.vmem %s46_s19, 16  ;;  %s689_s3 = scalar_lea.vmem %s46_s19, 32 }
  0x4e   :  { %p686_p7 = scmp.ne.s32.totalorder %s46_s19, %s685_s13  ;;  %p690_p8 = scmp.lt.s32.totalorder %s46_s19, %s46_s19 }
  0x4f   :  { %p691_p9 = scmp.lt.s32.totalorder %s689_s3, %s685_s13 }
  0x51   :  { %p692_p10 = por %p691_p9, %p690_p8 }
  0x53   :  { %p693_p11 = pnand %p692_p10, %p686_p7 }
  0x55   :  { %696 = shalt.err (!%p693_p11)
}
  0x56   :  { %48 = dma.hbm_to_vmem [thread:$0]  %s954_s2, 16, %s46_s19, [#allocation8]  }
  0x57   :  { %s780_s15 = smov [#allocation12]   ;;  %s781_s18 = smov [#allocation15]  }
  0x58   :  { %s67_s16 = sshll.u32 %s780_s15, 4  ;;  %s89_s20 = sshll.u32 %s781_s18, 4  ;;  %s68_s16 = int_to_ptr.vmem [resolvable:$true] %s67_s16  ;;  %s90_s20 = int_to_ptr.vmem [resolvable:$true] %s89_s20 }
  0x59   :  { %s697_s23 = scalar_lea.hbm %s956_s4, 16 }
  0x5a   :  { %p698_p12 = scmp.ne.s32.totalorder %s956_s4, %s697_s23  ;;  %p701_p13 = scmp.lt.u32.totalorder %s697_s23, %s956_s4 }
  0x5c   :  { %p703_p0 = pnand %p701_p13, %p698_p12 }
  0x5e   :  { %706 = shalt.err (!%p703_p0)
}
  0x5f   :  { %s707_s2 = scalar_lea.vmem %s68_s16, 16  ;;  %s711_s19 = scalar_lea.vmem %s68_s16, 32 }
  0x60   :  { %p708_p1 = scmp.ne.s32.totalorder %s68_s16, %s707_s2  ;;  %p712_p2 = scmp.lt.s32.totalorder %s68_s16, %s68_s16 }
  0x61   :  { %p713_p3 = scmp.lt.s32.totalorder %s711_s19, %s707_s2 }
  0x63   :  { %p714_p4 = por %p713_p3, %p712_p2 }
  0x65   :  { %p715_p5 = pnand %p714_p4, %p708_p1 }
  0x67   :  { %718 = shalt.err (!%p715_p5)
}
  0x68   :  { %70 = dma.hbm_to_vmem [thread:$0]  %s956_s4, 16, %s68_s16, [#allocation11]  }
  0x69   :  { %s719_s8 = scalar_lea.hbm %s958_s6, 16 }
  0x6a   :  { %p720_p6 = scmp.ne.s32.totalorder %s958_s6, %s719_s8  ;;  %p723_p7 = scmp.lt.u32.totalorder %s719_s8, %s958_s6 }
  0x6c   :  { %p725_p8 = pnand %p723_p7, %p720_p6 }
  0x6e   :  { %728 = shalt.err (!%p725_p8)
}
  0x6f   :  { %s729_s13 = scalar_lea.vmem %s90_s20, 16  ;;  %s733_s3 = scalar_lea.vmem %s90_s20, 32 }
  0x70   :  { %p730_p9 = scmp.ne.s32.totalorder %s90_s20, %s729_s13  ;;  %p734_p10 = scmp.lt.s32.totalorder %s90_s20, %s90_s20 }
  0x71   :  { %p735_p11 = scmp.lt.s32.totalorder %s733_s3, %s729_s13 }
  0x73   :  { %p736_p12 = por %p735_p11, %p734_p10 }
  0x75   :  { %p737_p13 = pnand %p736_p12, %p730_p9 }
  0x77   :  { %740 = shalt.err (!%p737_p13)
}
  0x78   :  { %92 = dma.hbm_to_vmem [thread:$0]  %s958_s6, 16, %s90_s20, [#allocation14]  }
  0x79   :  { %763 = dma.done.wait [#allocation5], 256  }
  0x7a   :  { %764 = vsyncadd [#allocation5], 4294967040 }
  0x7b   :  { %765 = dma.done.wait [#allocation8], 32  }
  0x7c   :  { %766 = vsyncadd [#allocation8], 4294967264 }
  0x7d   :  { %767 = dma.done.wait [#allocation11], 272  }
  0x7e   :  { %768 = vsyncadd [#allocation11], 4294967024 }
  0x7f   :  { %769 = dma.done.wait [#allocation14], 528  }
  0x80   :  { %770 = vsyncadd [#allocation14], 4294966768  ;;  %v508_v0 = vld [vmem:[#allocation4] sm:$0xff]   ;;  %vm127_vm0 = vcmask 261120   ;;  %v515_v1 = vld [vmem:[#allocation4 + $0x8] sm:$0xff]   ;;  %vm358_vm1 = vcmask 523264  }
  0x81   :  { %v509_v2 = vunpack.c.l.bf16 %v508_v0  ;;  %v513_v3 = vunpack.c.l.bf16 %v515_v1  ;;  %v510_v4 = vunpack.c.h.bf16 %v508_v0  ;;  %v514_v5 = vunpack.c.h.bf16 %v515_v1  ;;  %v557_v30 = vld [vmem:[#allocation10] sm:$0xff]   ;;  %v558_v31 = vld [vmem:[#allocation10 + $0x8] sm:$0xff]   ;;  %v481_v46 = vld [vmem:[#allocation7] ss:$0 sm:$0xff]  ;;  %s783_s6 = smov [#allocation16]  }
  0x82   :  { %526 = vmatprep.subr.bf16.mxu0 %v557_v30  ;;  %v482_v51 = vld [vmem:[#allocation9] ss:$0 sm:$0xff]  ;;  %vm456_vm2 = vcmask 257024   ;;  %s466_s14 = sshll.u32 %s783_s6, 4  ;;  %s467_s14 = int_to_ptr.vmem [resolvable:$true] %s466_s14 }
  0x83   :  { %v128_v6 = vsel %vm127_vm0, %v509_v2, 0.0  ;;  %v134_v7 = vsel %vm127_vm0, %v513_v3, 0.0  ;;  %v131_v8 = vsel %vm127_vm0, %v510_v4, 0.0  ;;  %v137_v9 = vsel %vm127_vm0, %v514_v5, 0.0  ;;  %527 = vmatpush3.bf16.msra.mxu0 %v557_v30  ;;  %s741_s15 = scalar_lea.vmem %s467_s14, 256  ;;  %p746_p1 = scmp.lt.s32.totalorder %s467_s14, %s467_s14 }
  0x84   :  { %129 = vadd.xlane.f32.xlu0 %v128_v6  ;;  %135 = vadd.xlane.f32.xlu1 %v134_v7  ;;  %v782_v6 = vmov 0.0   ;;  %v483_v7 = vld [vmem:[#allocation12] ss:$0 sm:$0xff]  ;;  %p742_p0 = scmp.ne.s32.totalorder %s467_s14, %s741_s15  ;;  %p747_p2 = scmp.lt.s32.totalorder %s741_s15, %s741_s15 }
  0x85   :  { %528 = vmatprep.subr.bf16.mxu0 %v558_v31  ;;  %209 = vst.msk [vmem:[#allocation3 + $0x10] sm:$0xff] %vm127_vm0, %v782_v6  ;;  %207 = vst.msk [vmem:[#allocation3] sm:$0xff] %vm127_vm0, %v782_v6 }
  0x86   :  { %208 = vst.msk [vmem:[#allocation3 + $0x8] sm:$0xff] %vm127_vm0, %v782_v6  ;;  %210 = vst.msk [vmem:[#allocation3 + $0x18] sm:$0xff] %vm127_vm0, %v782_v6  ;;  %p748_p3 = por %p747_p2, %p746_p1 }
  0x87   :  { %529 = vmatpush3.bf16.msra.mxu0 %v558_v31 }
  0x88   :  { %132 = vadd.xlane.f32.xlu0 %v131_v8  ;;  %138 = vadd.xlane.f32.xlu1 %v137_v9  ;;  %p749_p4 = pnand %p748_p3, %p742_p0 }
 0x111   :  { %v130_v10 = vpop.xlane.xlu0 %129  ;;  %v136_v11 = vpop.xlane.xlu1 %135 }
 0x112   :  { %v141_v12 = vmul.f32 0.03125, %v130_v10  ;;  %v143_v13 = vmul.f32 0.03125, %v136_v11 }
 0x114   :  { %v145_v14 = vsub.f32 %v509_v2, %v141_v12  ;;  %v147_v15 = vsub.f32 %v513_v3, %v143_v13  ;;  %v559_v2 = vld [vmem:[#allocation13] sm:$0xff]   ;;  %v560_v3 = vld [vmem:[#allocation13 + $0x8] sm:$0xff]  }
 0x115   :  { %v133_v16 = vpop.xlane.xlu0 %132  ;;  %v139_v17 = vpop.xlane.xlu1 %138  ;;  %534 = vmatprep.subr.bf16.mxu1 %v559_v2 }
 0x116   :  { %v142_v18 = vmul.f32 0.03125, %v133_v16  ;;  %v144_v19 = vmul.f32 0.03125, %v139_v17  ;;  %v149_v20 = vmul.f32 %v145_v14, %v145_v14  ;;  %v151_v21 = vmul.f32 %v147_v15, %v147_v15  ;;  %535 = vmatpush3.bf16.msra.mxu1 %v559_v2 }
 0x117   :  { %536 = vmatprep.subr.bf16.mxu1 %v560_v3 }
 0x118   :  { %v146_v22 = vsub.f32 %v510_v4, %v142_v18  ;;  %v148_v23 = vsub.f32 %v514_v5, %v144_v19  ;;  %v153_v24 = vsel %vm127_vm0, %v149_v20, 0.0  ;;  %v159_v25 = vsel %vm127_vm0, %v151_v21, 0.0  ;;  %v561_v4 = vld [vmem:[#allocation13 + $0x10] sm:$0xff]   ;;  %v562_v5 = vld [vmem:[#allocation13 + $0x18] sm:$0xff]  }
 0x119   :  { %154 = vadd.xlane.f32.xlu0 %v153_v24 }
 0x11a   :  { %v150_v26 = vmul.f32 %v146_v22, %v146_v22  ;;  %v152_v27 = vmul.f32 %v148_v23, %v148_v23  ;;  %537 = vmatpush3.bf16.msra.mxu1 %v560_v3 }
 0x11b   :  { %538 = vmatprep.subr.bf16.mxu1 %v561_v4 }
 0x11c   :  { %v156_v28 = vsel %vm127_vm0, %v150_v26, 0.0  ;;  %v162_v29 = vsel %vm127_vm0, %v152_v27, 0.0 }
 0x11d   :  { %160 = vadd.xlane.f32.xlu0 %v159_v25  ;;  %157 = vadd.xlane.f32.xlu1 %v156_v28 }
 0x11e   :  { %539 = vmatpush3.bf16.msra.mxu1 %v561_v4 }
 0x11f   :  { %540 = vmatprep.subr.bf16.mxu1 %v562_v5 }
 0x121   :  { %163 = vadd.xlane.f32.xlu1 %v162_v29 }
 0x122   :  { %541 = vmatpush3.bf16.msra.mxu1 %v562_v5 }
 0x1a6   :  { %v155_v32 = vpop.xlane.xlu0 %154 }
 0x1a7   :  { %v165_v33 = vmul.f32 0.03125, %v155_v32 }
 0x1a9   :  { %v169_v34 = vadd.f32 1e-05, %v165_v33 }
 0x1aa   :  { %v158_v35 = vpop.xlane.xlu1 %157  ;;  %v161_v36 = vpop.xlane.xlu0 %160 }
 0x1ab   :  { %563 = vrsqrt.f32 %v169_v34  ;;  %v166_v37 = vmul.f32 0.03125, %v158_v35  ;;  %v167_v38 = vmul.f32 0.03125, %v161_v36 }
 0x1ad   :  { %v170_v39 = vadd.f32 1e-05, %v166_v37  ;;  %v171_v40 = vadd.f32 1e-05, %v167_v38  ;;  %v322_v38 = vld [vmem:[#allocation3 + $0x10] sm:$0xff] }
 0x1ae   :  { %v164_v41 = vpop.xlane.xlu1 %163 }
 0x1af   :  { %565 = vrsqrt.f32 %v170_v39  ;;  %v168_v42 = vmul.f32 0.03125, %v164_v41  ;;  %v320_v39 = vld [vmem:[#allocation3] sm:$0xff]  ;;  %v323_v41 = vld [vmem:[#allocation3 + $0x18] sm:$0xff] }
 0x1b0   :  { %567 = vrsqrt.f32 %v171_v40 }
 0x1b1   :  { %v172_v43 = vadd.f32 1e-05, %v168_v42 }
 0x1b3   :  { %569 = vrsqrt.f32 %v172_v43 }
 0x1b5   :  { %v564_v44 = vpop.eup %563 }
 0x1b6   :  { %v177_v45 = vmul.f32 %v564_v44, %v145_v14  ;;  %v321_v44 = vld [vmem:[#allocation3 + $0x8] sm:$0xff] }
 0x1b8   :  { %v188_v49 = vmul.f32 %v481_v46, %v177_v45 }
 0x1b9   :  { %v566_v47 = vpop.eup %565 }
 0x1ba   :  { %v568_v48 = vpop.eup %567  ;;  %v178_v50 = vmul.f32 %v566_v47, %v146_v22  ;;  %v199_v55 = vadd.f32 %v482_v51, %v188_v49 }
 0x1bb   :  { %v179_v52 = vmul.f32 %v568_v48, %v147_v15 }
 0x1bc   :  { %v189_v53 = vmul.f32 %v481_v46, %v178_v50  ;;  %v498_v50 = vld [vmem:[#allocation15] ss:$0 sm:$0xff] }
 0x1bd   :  { %v570_v54 = vpop.eup %569  ;;  %v190_v57 = vmul.f32 %v481_v46, %v179_v52 }
 0x1be   :  { %v200_v56 = vadd.f32 %v482_v51, %v189_v53  ;;  %v180_v58 = vmul.f32 %v570_v54, %v148_v23 }
 0x1bf   :  { %v201_v61 = vadd.f32 %v482_v51, %v190_v57 }
 0x1c0   :  { %v203_v59 = vpack.c.bf16 %v200_v56, %v199_v55  ;;  %v191_v60 = vmul.f32 %v481_v46, %v180_v58 }
 0x1c2   :  { %205 = vst.msk [vmem:[#allocation2] sm:$0xff] %vm127_vm0, %v203_v59  ;;  %v202_v62 = vadd.f32 %v482_v51, %v191_v60 }
 0x1c4   :  { %v204_v63 = vpack.c.bf16 %v202_v62, %v201_v61 }
 0x1c6   :  { %206 = vst.msk [vmem:[#allocation2 + $0x8] sm:$0xff] %vm127_vm0, %v204_v63 }
 0x1c9   :  { %v211_v0 = vld [vmem:[#allocation2] sm:$0xff] }
 0x1ca   :  { %530 = vmatprep.mubr.msk.bf16.mxu0 %vm127_vm0, %v211_v0 }
 0x1cd   :  { %v212_v1 = vld [vmem:[#allocation2 + $0x8] sm:$0xff] }
 0x1ce   :  { %531 = vmatmul.mubr.msk.bf16.vlgmr.msra.gmra.mrb[0].mxu0 %vm127_vm0, %v212_v1 }
 0x2a1   :  { %v532_v8 = vpop.f32.mrb[0].mxu0 }
 0x2a2   :  { %v286_v9 = vadd.f32 %v532_v8, %v483_v7  ;;  %v277_v10 = vpop.f32.mrb[1].mxu0 }
 0x2a3   :  { %v278_v11 = vadd.f32 %v483_v7, %v277_v10  ;;  %v533_v12 = vpop.f32.mrb[2].mxu0 }
 0x2a4   :  { %v490_v13 = vmul.f32 -1.442695, %v286_v9  ;;  %v289_v14 = vadd.f32 %v533_v12, %v483_v7  ;;  %v280_v15 = vpop.f32.mrb[3].mxu0 }
 0x2a5   :  { %v488_v16 = vmul.f32 -1.442695, %v278_v11  ;;  %v281_v17 = vadd.f32 %v483_v7, %v280_v15 }
 0x2a6   :  { %571 = vpow2.f32 %v490_v13  ;;  %v491_v18 = vmul.f32 -1.442695, %v289_v14 }
 0x2a7   :  { %573 = vpow2.f32 %v488_v16  ;;  %v489_v19 = vmul.f32 -1.442695, %v281_v17 }
 0x2a8   :  { %575 = vpow2.f32 %v491_v18 }
 0x2a9   :  { %577 = vpow2.f32 %v489_v19 }
 0x2b0   :  { %v572_v20 = vpop.eup %571 }
 0x2b1   :  { %v574_v21 = vpop.eup %573  ;;  %v306_v22 = vadd.f32 1.0, %v572_v20 }
 0x2b2   :  { %v576_v23 = vpop.eup %575  ;;  %v304_v24 = vadd.f32 1.0, %v574_v21 }
 0x2b3   :  { %v578_v25 = vpop.eup %577  ;;  %579 = vrcp.f32 %v306_v22  ;;  %v307_v26 = vadd.f32 1.0, %v576_v23 }
 0x2b4   :  { %581 = vrcp.f32 %v304_v24  ;;  %v305_v27 = vadd.f32 1.0, %v578_v25 }
 0x2b5   :  { %583 = vrcp.f32 %v307_v26 }
 0x2b6   :  { %585 = vrcp.f32 %v305_v27 }
 0x2bd   :  { %v580_v28 = vpop.eup %579 }
 0x2be   :  { %v582_v29 = vpop.eup %581  ;;  %v318_v32 = vmul.f32 %v580_v28, %v286_v9 }
 0x2bf   :  { %v584_v30 = vpop.eup %583  ;;  %v316_v34 = vmul.f32 %v582_v29, %v278_v11 }
 0x2c0   :  { %v586_v31 = vpop.eup %585  ;;  %v319_v33 = vmul.f32 %v584_v30, %v289_v14 }
 0x2c1   :  { %v317_v35 = vmul.f32 %v586_v31, %v281_v17 }
 0x2c2   :  { %v325_v36 = vpack.c.bf16 %v319_v33, %v318_v32 }
 0x2c3   :  { %v324_v37 = vpack.c.bf16 %v317_v35, %v316_v34 }
 0x2c5   :  { %542 = vmatprep.mubr.msk.bf16.mxu1 %vm358_vm1, %v324_v37 }
 0x2c6   :  { %543 = vmatmul.mubr.msk.bf16.vlgmr.msra.gmra.mrb[0].mxu1 %vm358_vm1, %v325_v36 }
 0x399   :  { %v544_v40 = vpop.f32.mrb[0].mxu1 }
 0x39a   :  { %v416_v42 = vadd.f32 %v544_v40, %v322_v38  ;;  %v399_v43 = vpop.f32.mrb[1].mxu1 }
 0x39b   :  { %v414_v45 = vadd.f32 %v399_v43, %v320_v39  ;;  %v545_v46 = vpop.f32.mrb[2].mxu1 }
 0x39c   :  { %420 = vst.msk [vmem:[#allocation3 + $0x10] sm:$0xff] %vm127_vm0, %v416_v42  ;;  %v417_v47 = vadd.f32 %v545_v46, %v323_v41  ;;  %v402_v48 = vpop.f32.mrb[3].mxu1 }
 0x39d   :  { %418 = vst.msk [vmem:[#allocation3] sm:$0xff] %vm127_vm0, %v414_v45  ;;  %v415_v49 = vadd.f32 %v402_v48, %v321_v44 }
 0x39e   :  { %421 = vst.msk [vmem:[#allocation3 + $0x18] sm:$0xff] %vm127_vm0, %v417_v47 }
 0x39f   :  { %419 = vst.msk [vmem:[#allocation3 + $0x8] sm:$0xff] %vm127_vm0, %v415_v49 }
 0x3a3   :  { %v427_v51 = vld [vmem:[#allocation3 + $0x10] sm:$0xff] }
 0x3a4   :  { %v425_v52 = vld [vmem:[#allocation3] sm:$0xff]  ;;  %v438_v53 = vadd.f32 %v498_v50, %v427_v51 }
 0x3a5   :  { %v428_v54 = vld [vmem:[#allocation3 + $0x18] sm:$0xff]  ;;  %v436_v55 = vadd.f32 %v498_v50, %v425_v52 }
 0x3a6   :  { %v426_v56 = vld [vmem:[#allocation3 + $0x8] sm:$0xff]  ;;  %v439_v57 = vadd.f32 %v498_v50, %v428_v54  ;;  %v505_v58 = vpack.c.bf16 %v438_v53, %v438_v53 }
 0x3a7   :  { %v437_v59 = vadd.f32 %v498_v50, %v426_v56  ;;  %v503_v60 = vpack.c.bf16 %v436_v55, %v436_v55 }
 0x3a8   :  { %v506_v61 = vpack.c.bf16 %v439_v57, %v439_v57  ;;  %459 = vst.msk [vmem:[#allocation16 + $0x8] sm:$0xf] %vm456_vm2, %v505_v58 }
 0x3a9   :  { %v504_v62 = vpack.c.bf16 %v437_v59, %v437_v59  ;;  %457 = vst.msk [vmem:[#allocation16] sm:$0xf] %vm456_vm2, %v503_v60 }
 0x3aa   :  { %460 = vst.msk [vmem:[#allocation16 + $0xc] sm:$0xf] %vm456_vm2, %v506_v61 }
 0x3ab   :  { %458 = vst.msk [vmem:[#allocation16 + $0x4] sm:$0xf] %vm456_vm2, %v504_v62 }
 0x3ac   :  { %752 = shalt.err (!%p749_p4)
}
 0x3ad   :  { %s753_s20 = scalar_lea.hbm %s959_s7, 256 }
 0x3ae   :  { %p754_p5 = scmp.ne.s32.totalorder %s959_s7, %s753_s20  ;;  %p757_p6 = scmp.lt.u32.totalorder %s753_s20, %s959_s7 }
 0x3b0   :  { %p759_p7 = pnand %p757_p6, %p754_p5 }
 0x3b2   :  { %762 = shalt.err (!%p759_p7)
}
 0x3b3   :  { %472 = dma.vmem_to_hbm [thread:$0]  %s467_s14, 256, %s959_s7, [#allocation6], %s776_s25, %s776_s25, %s777_s26  }
 0x3b4   :  { %771 = dma.done.wait [#allocation6], 256  }
 0x3b5   :  { %772 = vsyncadd [#allocation6], 4294967040 }
 0x3b6   :  { %476 = vsyncpa [#allocation5], 1 }
 0x3b7   :  { %477 = vsyncpa [#allocation8], 1 }
 0x3b8   :  { %478 = vsyncpa [#allocation11], 1 }
 0x3b9   :  { %479 = vsyncpa [#allocation14], 1 }
 0x3ba   :  { %480 = vsyncpa [#allocation6], 1 }

</bundles_post_ra>
